<compile_context>
chip_gen: v7x
topology: tpu7x:2x2x1
jax: 0.10.0
libtpu: 0.0.40
codegen_flags: <defaults>
</compile_context>

<pallas_src>
import functools

import jax
import jax.numpy as jnp
from jax.experimental import pallas as pl
from jax.experimental.pallas import tpu as pltpu


def _round_up(x, m):
    return (x + m - 1) // m * m


def _pick_cout_tile(coutp):
    if coutp <= 256:
        return coutp
    for t in (256, 128, 64, 32, 16, 8):
        if coutp % t == 0:
            return t
    return coutp


# ------------------------- Pallas kernels -------------------------

def _conv_stats_kernel(x_ref, w_ref, mask_ref, y_ref, sum_ref, sq_ref,
                       *, kh, kw, wp, stride, inv_cnt):
    """One (image, Cout-tile): conv as a sum of kh*kw shifted GEMMs + BN partial stats.

    x_ref:    (1, Cin, Lp)       flattened zero-padded image (lane-dense)
    w_ref:    (kh*kw, TCO, Cin)  per-tap weight matrices
    mask_ref: (1, Mw)            1.0 on valid output lanes, 0.0 on working-width garbage
    y_ref:    (1, TCO, Mw)       conv output on the working (width=Wp) flat grid
    sum_ref:  (1, TCO, 1)        per-image per-channel sum over valid lanes
    sq_ref:   (1, TCO, 1)        per-image per-channel mean-centered sum of squares
    """
    mw = y_ref.shape[2]
    acc = None
    for ki in range(kh):
        for kj in range(kw):
            off = ki * wp + kj
            if stride == 1:
                xs = x_ref[0, :, off:off + mw]                      # (Cin, Mw)
            else:
                xs = x_ref[0, :, pl.ds(off, mw, stride=stride)]     # (Cin, Mw)
            part = jnp.dot(w_ref[ki * kw + kj], xs,
                           preferred_element_type=jnp.float32)      # (TCO, Mw)
            acc = part if acc is None else acc + part
    y_ref[0] = acc

    m = mask_ref[...]                                   # (1, Mw)
    masked = acc * m
    s1 = jnp.sum(masked, axis=1, keepdims=True)         # (TCO, 1)
    mu = s1 * inv_cnt                                    # per-image per-channel mean
    d = (acc - mu) * m
    s2 = jnp.sum(d * d, axis=1, keepdims=True)           # centered sum of squares
    sum_ref[0] = s1
    sq_ref[0] = s2


def _bn_lrelu_kernel(y_ref, scale_ref, shift_ref, o_ref, *, cout, ow, slope):
    """BN affine + LeakyReLU; writes the final NCHW block directly (crop Wp->OW)."""
    z = y_ref[0] * scale_ref[...] + shift_ref[...]      # (Coutp, OH, Wp)
    z = jnp.where(z >= 0, z, slope * z)
    o_ref[0] = z[:cout, :, :ow]                         # (Cout, OH, OW)


# ------------------------- Host-side glue -------------------------

@functools.partial(jax.jit, static_argnames=("stride", "padding", "eps", "slope"))
def myconv_forward(x, w, b, gamma, beta, *, stride, padding, eps=1e-5, slope=0.2):
    """Conv2d + BatchNorm2d (training-mode batch stats) + LeakyReLU(slope). NCHW in/out."""
    del b  # Exactly absorbed by training-mode BN (per-channel constant); kept for API parity.
    f32 = jnp.float32
    N, Cin, H, W = x.shape
    Cout, _, kh, kw = w.shape
    OH = (H + 2 * padding - kh) // stride + 1
    OW = (W + 2 * padding - kw) // stride + 1
    Hp, Wp = H + 2 * padding, W + 2 * padding
    KK = kh * kw

    Coutp = _round_up(Cout, 8)
    TCO = _pick_cout_tile(Coutp)
    CT = Coutp // TCO

    Mw = OH * Wp                                      # working flat output length per image
    need = (kh - 1) * Wp + (kw - 1) + stride * (Mw - 1) + 1
    Lp = _round_up(max(need, Hp * Wp), 128)           # lane-dense flattened input length

    # ---- cheap host prep (single pad pass; ~1x input bytes, no kh*kw duplication) ----
    xp = jnp.pad(x.astype(f32),
                 ((0, 0), (0, 0), (padding, padding), (padding, padding)))
    xflat = jnp.pad(xp.reshape(N, Cin, Hp * Wp), ((0, 0), (0, 0), (0, Lp - Hp * Wp)))

    wmat = jnp.pad(w.reshape(Cout, Cin, KK).astype(f32),
                   ((0, Coutp - Cout), (0, 0), (0, 0)))
    wmat = jnp.transpose(wmat, (2, 0, 1))             # (KK, Coutp, Cin)

    lane = jnp.arange(Mw, dtype=jnp.int32)
    mask = ((lane % Wp) < OW).astype(f32).reshape(1, Mw)

    conv_kernel = functools.partial(_conv_stats_kernel, kh=kh, kw=kw, wp=Wp,
                                    stride=stride, inv_cnt=1.0 / float(OH * OW))

    # ---- Kernel 1: fused conv (shifted GEMMs) + per-image BN partial stats ----
    y_flat, s1, s2 = pl.pallas_call(
        conv_kernel,
        out_shape=(
            jax.ShapeDtypeStruct((N, Coutp, Mw), f32),
            jax.ShapeDtypeStruct((N, Coutp, 1), f32),
            jax.ShapeDtypeStruct((N, Coutp, 1), f32),
        ),
        grid_spec=pltpu.PrefetchScalarGridSpec(
            num_scalar_prefetch=0,
            grid=(N, CT),
            in_specs=[
                pl.BlockSpec((1, Cin, Lp), lambda n, c: (n, 0, 0)),
                pl.BlockSpec((KK, TCO, Cin), lambda n, c: (0, c, 0)),
                pl.BlockSpec((1, Mw), lambda n, c: (0, 0)),
            ],
            out_specs=[
                pl.BlockSpec((1, TCO, Mw), lambda n, c: (n, c, 0)),
                pl.BlockSpec((1, TCO, 1), lambda n, c: (n, c, 0)),
                pl.BlockSpec((1, TCO, 1), lambda n, c: (n, c, 0)),
            ],
        ),
        compiler_params=pltpu.CompilerParams(
            dimension_semantics=("parallel", "parallel")),
    )(xflat, wmat, mask)

    # ---- tiny per-channel combine (parallel-variance formula; biased var like BN) ----
    cnt = OH * OW
    total = N * cnt
    ch_sum = jnp.sum(s1, axis=0)                      # (Coutp, 1)
    mean = ch_sum / total
    mu_img = s1 / cnt                                 # (N, Coutp, 1)
    m2 = jnp.sum(s2, axis=0) + cnt * jnp.sum((mu_img - mean[None]) ** 2, axis=0)
    var = m2 / total
    inv_std = jax.lax.rsqrt(var + eps)
    gamma_p = jnp.pad(gamma.astype(f32), (0, Coutp - Cout)).reshape(Coutp, 1)
    beta_p = jnp.pad(beta.astype(f32), (0, Coutp - Cout)).reshape(Coutp, 1)
    scale = gamma_p * inv_std                         # (Coutp, 1)
    shift = beta_p - mean * scale                     # (Coutp, 1)

    # ---- Kernel 2: BN affine + LeakyReLU, writes NCHW output directly ----
    bn_kernel = functools.partial(_bn_lrelu_kernel, cout=Cout, ow=OW, slope=slope)
    y4 = y_flat.reshape(N, Coutp, OH, Wp)             # contiguous reshape: no data movement
    out = pl.pallas_call(
        bn_kernel,
        out_shape=jax.ShapeDtypeStruct((N, Cout, OH, OW), f32),
        grid_spec=pltpu.PrefetchScalarGridSpec(
            num_scalar_prefetch=0,
            grid=(N,),
            in_specs=[
                pl.BlockSpec((1, Coutp, OH, Wp), lambda n: (n, 0, 0, 0)),
                pl.BlockSpec((Coutp, 1, 1), lambda n: (0, 0, 0)),
                pl.BlockSpec((Coutp, 1, 1), lambda n: (0, 0, 0)),
            ],
            out_specs=pl.BlockSpec((1, Cout, OH, OW), lambda n: (n, 0, 0, 0)),
        ),
        compiler_params=pltpu.CompilerParams(dimension_semantics=("parallel",)),
    )(y4, scale.reshape(Coutp, 1, 1), shift.reshape(Coutp, 1, 1))
    return out


# ------------------------- Demo / correctness -------------------------

if __name__ == "__main__":
    key = jax.random.PRNGKey(0)
    k_x, k_w, k_b, k_g, k_be = jax.random.split(key, 5)

    # Myconv(in_c=4, out_c=8, kernel_size=3, stride=1, padding=1,
    #        activate='LeakyReLU', is_bn=True)
    N, Cin, H, W = 2, 4, 16, 16
    Cout, kh, kw, stride, padding = 8, 3, 3, 1, 1

    x = jax.random.normal(k_x, (N, Cin, H, W), dtype=jnp.float32)
    w = jax.random.normal(k_w, (Cout, Cin, kh, kw), dtype=jnp.float32) * 0.1
    b = jax.random.normal(k_b, (Cout,), dtype=jnp.float32) * 0.1
    gamma = 1.0 + 0.1 * jax.random.normal(k_g, (Cout,), dtype=jnp.float32)
    beta = 0.1 * jax.random.normal(k_be, (Cout,), dtype=jnp.float32)

    out = myconv_forward(x, w, b, gamma, beta, stride=stride, padding=padding)
    out = jax.block_until_ready(out)

    # Pure-JAX reference (conv + bias + training-mode BN + LeakyReLU(0.2)).
    ref = jax.lax.conv_general_dilated(
        x, w, (stride, stride), [(padding, padding), (padding, padding)],
        dimension_numbers=("NCHW", "OIHW", "NCHW"),
    ) + b.reshape(1, Cout, 1, 1)
    mu = ref.mean(axis=(0, 2, 3), keepdims=True)
    va = ref.var(axis=(0, 2, 3), keepdims=True)  # biased, like BN normalization
    ref = (ref - mu) / jnp.sqrt(va + 1e-5) * gamma.reshape(1, Cout, 1, 1) \
        + beta.reshape(1, Cout, 1, 1)
    ref = jnp.where(ref >= 0, ref, 0.2 * ref)

    assert out.shape == (N, Cout, H, W), out.shape
    err = float(jnp.max(jnp.abs(out - ref)))
    assert err < 1e-4, err
    print("KERNEL_OK")
</pallas_src>

<mosaic_0001>
module attributes {stable_mosaic.version = 11 : i64} {
  func.func @_bn_lrelu_kernel(%arg0: i32, %arg1: memref<1x8x16x18xf32, #tpu.memory_space<vmem>>, %arg2: memref<8x1x1xf32, #tpu.memory_space<vmem>>, %arg3: memref<8x1x1xf32, #tpu.memory_space<vmem>>, %arg4: memref<1x8x16x16xf32, #tpu.memory_space<vmem>>) attributes {dimension_semantics = [#tpu.dimension_semantics<parallel>], iteration_bounds = array<i64: 2>, scalar_prefetch = 0 : i64, scratch_operands = 0 : i64, tpu.core_type = #tpu.core_type<tc>, window_params = [{transform_indices = @transform_0, window_bounds = array<i64: 1, 8, 16, 18>}, {pipeline_mode = #tpu.pipeline_mode<synchronous>, transform_indices = @transform_1, window_bounds = array<i64: 8, 1, 1>}, {pipeline_mode = #tpu.pipeline_mode<synchronous>, transform_indices = @transform_2, window_bounds = array<i64: 8, 1, 1>}, {transform_indices = @transform_3, window_bounds = array<i64: 1, 8, 16, 16>}]} {
    %c0 = arith.constant 0 : index
    %c0_0 = arith.constant 0 : index
    %c0_1 = arith.constant 0 : index
    %c0_2 = arith.constant 0 : index
    %0 = vector.load %arg1[%c0, %c0_0, %c0_1, %c0_2] : memref<1x8x16x18xf32, #tpu.memory_space<vmem>>, vector<1x8x16x18xf32>
    %1 = vector.shape_cast %0 : vector<1x8x16x18xf32> to vector<8x16x18xf32>
    %c0_3 = arith.constant 0 : index
    %c0_4 = arith.constant 0 : index
    %c0_5 = arith.constant 0 : index
    %2 = vector.load %arg2[%c0_3, %c0_4, %c0_5] : memref<8x1x1xf32, #tpu.memory_space<vmem>>, vector<8x1x1xf32>
    %3 = vector.broadcast %2 : vector<8x1x1xf32> to vector<8x16x18xf32>
    %4 = arith.mulf %1, %3 : vector<8x16x18xf32>
    %c0_6 = arith.constant 0 : index
    %c0_7 = arith.constant 0 : index
    %c0_8 = arith.constant 0 : index
    %5 = vector.load %arg3[%c0_6, %c0_7, %c0_8] : memref<8x1x1xf32, #tpu.memory_space<vmem>>, vector<8x1x1xf32>
    %6 = vector.broadcast %5 : vector<8x1x1xf32> to vector<8x16x18xf32>
    %7 = arith.addf %4, %6 : vector<8x16x18xf32>
    %cst = arith.constant 0.000000e+00 : f32
    %8 = vector.broadcast %cst : f32 to vector<8x16x18xf32>
    %9 = arith.cmpf oge, %7, %8 : vector<8x16x18xf32>
    %cst_9 = arith.constant 2.000000e-01 : f32
    %10 = vector.broadcast %cst_9 : f32 to vector<8x16x18xf32>
    %11 = arith.mulf %10, %7 : vector<8x16x18xf32>
    %12 = arith.select %9, %7, %11 : vector<8x16x18xi1>, vector<8x16x18xf32>
    %13 = vector.extract_strided_slice %12 {offsets = [0, 0, 0], sizes = [8, 16, 16], strides = [1, 1, 1]} : vector<8x16x18xf32> to vector<8x16x16xf32>
    %c0_10 = arith.constant 0 : index
    %c0_11 = arith.constant 0 : index
    %c0_12 = arith.constant 0 : index
    %c0_13 = arith.constant 0 : index
    %14 = vector.load %arg4[%c0_10, %c0_11, %c0_12, %c0_13] : memref<1x8x16x16xf32, #tpu.memory_space<vmem>>, vector<1x8x16x16xf32>
    %15 = vector.shape_cast %14 : vector<1x8x16x16xf32> to vector<8x16x16xf32>
    %16 = vector.shape_cast %13 : vector<8x16x16xf32> to vector<1x8x16x16xf32>
    tpu.vector_store %arg4[%c0_10, %c0_11, %c0_12, %c0_13], %16 {strides = array<i32>} : memref<1x8x16x16xf32, #tpu.memory_space<vmem>>, vector<1x8x16x16xf32>,
    return
  }
  func.func @transform_0(%arg0: i32) -> (i32, i32, i32, i32) {
    %c0_i32 = arith.constant 0 : i32
    %c0_i32_0 = arith.constant 0 : i32
    %c0_i32_1 = arith.constant 0 : i32
    %c0_i32_2 = arith.constant 0 : i32
    return %arg0, %c0_i32, %c0_i32_0, %c0_i32_1 : i32, i32, i32, i32
  }
  func.func @transform_1(%arg0: i32) -> (i32, i32, i32) {
    %c0_i32 = arith.constant 0 : i32
    %c0_i32_0 = arith.constant 0 : i32
    %c0_i32_1 = arith.constant 0 : i32
    %c0_i32_2 = arith.constant 0 : i32
    return %c0_i32, %c0_i32_0, %c0_i32_1 : i32, i32, i32
  }
  func.func @transform_2(%arg0: i32) -> (i32, i32, i32) {
    %c0_i32 = arith.constant 0 : i32
    %c0_i32_0 = arith.constant 0 : i32
    %c0_i32_1 = arith.constant 0 : i32
    %c0_i32_2 = arith.constant 0 : i32
    return %c0_i32, %c0_i32_0, %c0_i32_1 : i32, i32, i32
  }
  func.func @transform_3(%arg0: i32) -> (i32, i32, i32, i32) {
    %c0_i32 = arith.constant 0 : i32
    %c0_i32_0 = arith.constant 0 : i32
    %c0_i32_1 = arith.constant 0 : i32
    %c0_i32_2 = arith.constant 0 : i32
    return %arg0, %c0_i32, %c0_i32_0, %c0_i32_1 : i32, i32, i32, i32
  }
}

module attributes {stable_mosaic.version = 11 : i64} {
  func.func @_conv_stats_kernel(%arg0: i32, %arg1: i32, %arg2: memref<1x4x384xf32, #tpu.memory_space<vmem>>, %arg3: memref<9x8x4xf32, #tpu.memory_space<vmem>>, %arg4: memref<1x288xf32, #tpu.memory_space<vmem>>, %arg5: memref<1x8x288xf32, #tpu.memory_space<vmem>>, %arg6: memref<1x8x1xf32, #tpu.memory_space<vmem>>, %arg7: memref<1x8x1xf32, #tpu.memory_space<vmem>>) attributes {dimension_semantics = [#tpu.dimension_semantics<parallel>, #tpu.dimension_semantics<parallel>], iteration_bounds = array<i64: 2, 1>, scalar_prefetch = 0 : i64, scratch_operands = 0 : i64, tpu.core_type = #tpu.core_type<tc>, window_params = [{transform_indices = @transform_0, window_bounds = array<i64: 1, 4, 384>}, {transform_indices = @transform_1, window_bounds = array<i64: 9, 8, 4>}, {pipeline_mode = #tpu.pipeline_mode<synchronous>, transform_indices = @transform_2, window_bounds = array<i64: 1, 288>}, {transform_indices = @transform_3, window_bounds = array<i64: 1, 8, 288>}, {transform_indices = @transform_4, window_bounds = array<i64: 1, 8, 1>}, {transform_indices = @transform_5, window_bounds = array<i64: 1, 8, 1>}]} {
    %c0 = arith.constant 0 : index
    %c0_0 = arith.constant 0 : index
    %c0_1 = arith.constant 0 : index
    %0 = vector.load %arg2[%c0, %c0_0, %c0_1] : memref<1x4x384xf32, #tpu.memory_space<vmem>>, vector<1x4x288xf32>
    %1 = vector.shape_cast %0 : vector<1x4x288xf32> to vector<4x288xf32>
    %c0_2 = arith.constant 0 : index
    %c0_3 = arith.constant 0 : index
    %c0_4 = arith.constant 0 : index
    %2 = vector.load %arg3[%c0_2, %c0_3, %c0_4] : memref<9x8x4xf32, #tpu.memory_space<vmem>>, vector<1x8x4xf32>
    %3 = vector.shape_cast %2 : vector<1x8x4xf32> to vector<8x4xf32>
    %cst = arith.constant dense<0.000000e+00> : vector<8x288xf32>
    %4 = tpu.matmul %3, %1, %cst {dimension_numbers = #tpu.dot_dimension_numbers<[1], [0], [0], [1], [0, 0, 1, 1], [], []>} : vector<8x4xf32>, vector<4x288xf32>, vector<8x288xf32> -> vector<8x288xf32>
    %c0_5 = arith.constant 0 : index
    %c0_6 = arith.constant 0 : index
    %c1 = arith.constant 1 : index
    %5 = vector.load %arg2[%c0_5, %c0_6, %c1] : memref<1x4x384xf32, #tpu.memory_space<vmem>>, vector<1x4x288xf32>
    %6 = vector.shape_cast %5 : vector<1x4x288xf32> to vector<4x288xf32>
    %c1_7 = arith.constant 1 : index
    %c0_8 = arith.constant 0 : index
    %c0_9 = arith.constant 0 : index
    %7 = vector.load %arg3[%c1_7, %c0_8, %c0_9] : memref<9x8x4xf32, #tpu.memory_space<vmem>>, vector<1x8x4xf32>
    %8 = vector.shape_cast %7 : vector<1x8x4xf32> to vector<8x4xf32>
    %cst_10 = arith.constant dense<0.000000e+00> : vector<8x288xf32>
    %9 = tpu.matmul %8, %6, %cst_10 {dimension_numbers = #tpu.dot_dimension_numbers<[1], [0], [0], [1], [0, 0, 1, 1], [], []>} : vector<8x4xf32>, vector<4x288xf32>, vector<8x288xf32> -> vector<8x288xf32>
    %10 = arith.addf %4, %9 : vector<8x288xf32>
    %c0_11 = arith.constant 0 : index
    %c0_12 = arith.constant 0 : index
    %c2 = arith.constant 2 : index
    %11 = vector.load %arg2[%c0_11, %c0_12, %c2] : memref<1x4x384xf32, #tpu.memory_space<vmem>>, vector<1x4x288xf32>
    %12 = vector.shape_cast %11 : vector<1x4x288xf32> to vector<4x288xf32>
    %c2_13 = arith.constant 2 : index
    %c0_14 = arith.constant 0 : index
    %c0_15 = arith.constant 0 : index
    %13 = vector.load %arg3[%c2_13, %c0_14, %c0_15] : memref<9x8x4xf32, #tpu.memory_space<vmem>>, vector<1x8x4xf32>
    %14 = vector.shape_cast %13 : vector<1x8x4xf32> to vector<8x4xf32>
    %cst_16 = arith.constant dense<0.000000e+00> : vector<8x288xf32>
    %15 = tpu.matmul %14, %12, %cst_16 {dimension_numbers = #tpu.dot_dimension_numbers<[1], [0], [0], [1], [0, 0, 1, 1], [], []>} : vector<8x4xf32>, vector<4x288xf32>, vector<8x288xf32> -> vector<8x288xf32>
    %16 = arith.addf %10, %15 : vector<8x288xf32>
    %c0_17 = arith.constant 0 : index
    %c0_18 = arith.constant 0 : index
    %c18 = arith.constant 18 : index
    %17 = vector.load %arg2[%c0_17, %c0_18, %c18] : memref<1x4x384xf32, #tpu.memory_space<vmem>>, vector<1x4x288xf32>
    %18 = vector.shape_cast %17 : vector<1x4x288xf32> to vector<4x288xf32>
    %c3 = arith.constant 3 : index
    %c0_19 = arith.constant 0 : index
    %c0_20 = arith.constant 0 : index
    %19 = vector.load %arg3[%c3, %c0_19, %c0_20] : memref<9x8x4xf32, #tpu.memory_space<vmem>>, vector<1x8x4xf32>
    %20 = vector.shape_cast %19 : vector<1x8x4xf32> to vector<8x4xf32>
    %cst_21 = arith.constant dense<0.000000e+00> : vector<8x288xf32>
    %21 = tpu.matmul %20, %18, %cst_21 {dimension_numbers = #tpu.dot_dimension_numbers<[1], [0], [0], [1], [0, 0, 1, 1], [], []>} : vector<8x4xf32>, vector<4x288xf32>, vector<8x288xf32> -> vector<8x288xf32>
    %22 = arith.addf %16, %21 : vector<8x288xf32>
    %c0_22 = arith.constant 0 : index
    %c0_23 = arith.constant 0 : index
    %c19 = arith.constant 19 : index
    %23 = vector.load %arg2[%c0_22, %c0_23, %c19] : memref<1x4x384xf32, #tpu.memory_space<vmem>>, vector<1x4x288xf32>
    %24 = vector.shape_cast %23 : vector<1x4x288xf32> to vector<4x288xf32>
    %c4 = arith.constant 4 : index
    %c0_24 = arith.constant 0 : index
    %c0_25 = arith.constant 0 : index
    %25 = vector.load %arg3[%c4, %c0_24, %c0_25] : memref<9x8x4xf32, #tpu.memory_space<vmem>>, vector<1x8x4xf32>
    %26 = vector.shape_cast %25 : vector<1x8x4xf32> to vector<8x4xf32>
    %cst_26 = arith.constant dense<0.000000e+00> : vector<8x288xf32>
    %27 = tpu.matmul %26, %24, %cst_26 {dimension_numbers = #tpu.dot_dimension_numbers<[1], [0], [0], [1], [0, 0, 1, 1], [], []>} : vector<8x4xf32>, vector<4x288xf32>, vector<8x288xf32> -> vector<8x288xf32>
    %28 = arith.addf %22, %27 : vector<8x288xf32>
    %c0_27 = arith.constant 0 : index
    %c0_28 = arith.constant 0 : index
    %c20 = arith.constant 20 : index
    %29 = vector.load %arg2[%c0_27, %c0_28, %c20] : memref<1x4x384xf32, #tpu.memory_space<vmem>>, vector<1x4x288xf32>
    %30 = vector.shape_cast %29 : vector<1x4x288xf32> to vector<4x288xf32>
    %c5 = arith.constant 5 : index
    %c0_29 = arith.constant 0 : index
    %c0_30 = arith.constant 0 : index
    %31 = vector.load %arg3[%c5, %c0_29, %c0_30] : memref<9x8x4xf32, #tpu.memory_space<vmem>>, vector<1x8x4xf32>
    %32 = vector.shape_cast %31 : vector<1x8x4xf32> to vector<8x4xf32>
    %cst_31 = arith.constant dense<0.000000e+00> : vector<8x288xf32>
    %33 = tpu.matmul %32, %30, %cst_31 {dimension_numbers = #tpu.dot_dimension_numbers<[1], [0], [0], [1], [0, 0, 1, 1], [], []>} : vector<8x4xf32>, vector<4x288xf32>, vector<8x288xf32> -> vector<8x288xf32>
    %34 = arith.addf %28, %33 : vector<8x288xf32>
    %c0_32 = arith.constant 0 : index
    %c0_33 = arith.constant 0 : index
    %c36 = arith.constant 36 : index
    %35 = vector.load %arg2[%c0_32, %c0_33, %c36] : memref<1x4x384xf32, #tpu.memory_space<vmem>>, vector<1x4x288xf32>
    %36 = vector.shape_cast %35 : vector<1x4x288xf32> to vector<4x288xf32>
    %c6 = arith.constant 6 : index
    %c0_34 = arith.constant 0 : index
    %c0_35 = arith.constant 0 : index
    %37 = vector.load %arg3[%c6, %c0_34, %c0_35] : memref<9x8x4xf32, #tpu.memory_space<vmem>>, vector<1x8x4xf32>
    %38 = vector.shape_cast %37 : vector<1x8x4xf32> to vector<8x4xf32>
    %cst_36 = arith.constant dense<0.000000e+00> : vector<8x288xf32>
    %39 = tpu.matmul %38, %36, %cst_36 {dimension_numbers = #tpu.dot_dimension_numbers<[1], [0], [0], [1], [0, 0, 1, 1], [], []>} : vector<8x4xf32>, vector<4x288xf32>, vector<8x288xf32> -> vector<8x288xf32>
    %40 = arith.addf %34, %39 : vector<8x288xf32>
    %c0_37 = arith.constant 0 : index
    %c0_38 = arith.constant 0 : index
    %c37 = arith.constant 37 : index
    %41 = vector.load %arg2[%c0_37, %c0_38, %c37] : memref<1x4x384xf32, #tpu.memory_space<vmem>>, vector<1x4x288xf32>
    %42 = vector.shape_cast %41 : vector<1x4x288xf32> to vector<4x288xf32>
    %c7 = arith.constant 7 : index
    %c0_39 = arith.constant 0 : index
    %c0_40 = arith.constant 0 : index
    %43 = vector.load %arg3[%c7, %c0_39, %c0_40] : memref<9x8x4xf32, #tpu.memory_space<vmem>>, vector<1x8x4xf32>
    %44 = vector.shape_cast %43 : vector<1x8x4xf32> to vector<8x4xf32>
    %cst_41 = arith.constant dense<0.000000e+00> : vector<8x288xf32>
    %45 = tpu.matmul %44, %42, %cst_41 {dimension_numbers = #tpu.dot_dimension_numbers<[1], [0], [0], [1], [0, 0, 1, 1], [], []>} : vector<8x4xf32>, vector<4x288xf32>, vector<8x288xf32> -> vector<8x288xf32>
    %46 = arith.addf %40, %45 : vector<8x288xf32>
    %c0_42 = arith.constant 0 : index
    %c0_43 = arith.constant 0 : index
    %c38 = arith.constant 38 : index
    %47 = vector.load %arg2[%c0_42, %c0_43, %c38] : memref<1x4x384xf32, #tpu.memory_space<vmem>>, vector<1x4x288xf32>
    %48 = vector.shape_cast %47 : vector<1x4x288xf32> to vector<4x288xf32>
    %c8 = arith.constant 8 : index
    %c0_44 = arith.constant 0 : index
    %c0_45 = arith.constant 0 : index
    %49 = vector.load %arg3[%c8, %c0_44, %c0_45] : memref<9x8x4xf32, #tpu.memory_space<vmem>>, vector<1x8x4xf32>
    %50 = vector.shape_cast %49 : vector<1x8x4xf32> to vector<8x4xf32>
    %cst_46 = arith.constant dense<0.000000e+00> : vector<8x288xf32>
    %51 = tpu.matmul %50, %48, %cst_46 {dimension_numbers = #tpu.dot_dimension_numbers<[1], [0], [0], [1], [0, 0, 1, 1], [], []>} : vector<8x4xf32>, vector<4x288xf32>, vector<8x288xf32> -> vector<8x288xf32>
    %52 = arith.addf %46, %51 : vector<8x288xf32>
    %c0_47 = arith.constant 0 : index
    %c0_48 = arith.constant 0 : index
    %c0_49 = arith.constant 0 : index
    %53 = vector.load %arg5[%c0_47, %c0_48, %c0_49] : memref<1x8x288xf32, #tpu.memory_space<vmem>>, vector<1x8x288xf32>
    %54 = vector.shape_cast %53 : vector<1x8x288xf32> to vector<8x288xf32>
    %55 = vector.shape_cast %52 : vector<8x288xf32> to vector<1x8x288xf32>
    tpu.vector_store %arg5[%c0_47, %c0_48, %c0_49], %55 {strides = array<i32>} : memref<1x8x288xf32, #tpu.memory_space<vmem>>, vector<1x8x288xf32>,
    %c0_50 = arith.constant 0 : index
    %c0_51 = arith.constant 0 : index
    %56 = vector.load %arg4[%c0_50, %c0_51] : memref<1x288xf32, #tpu.memory_space<vmem>>, vector<1x288xf32>
    %57 = vector.broadcast %56 : vector<1x288xf32> to vector<8x288xf32>
    %58 = arith.mulf %52, %57 : vector<8x288xf32>
    %cst_52 = arith.constant dense<0.000000e+00> : vector<8xf32>
    %59 = vector.multi_reduction <add>, %58, %cst_52 [1] : vector<8x288xf32> to vector<8xf32>
    %60 = vector.shape_cast %59 : vector<8xf32> to vector<8x1xf32>
    %cst_53 = arith.constant 3.906250e-03 : f32
    %61 = vector.broadcast %cst_53 : f32 to vector<8x1xf32>
    %62 = arith.mulf %60, %61 : vector<8x1xf32>
    %63 = vector.broadcast %62 : vector<8x1xf32> to vector<8x288xf32>
    %64 = arith.subf %52, %63 : vector<8x288xf32>
    %65 = vector.broadcast %56 : vector<1x288xf32> to vector<8x288xf32>
    %66 = arith.mulf %64, %65 : vector<8x288xf32>
    %67 = arith.mulf %66, %66 : vector<8x288xf32>
    %cst_54 = arith.constant dense<0.000000e+00> : vector<8xf32>
    %68 = vector.multi_reduction <add>, %67, %cst_54 [1] : vector<8x288xf32> to vector<8xf32>
    %69 = vector.shape_cast %68 : vector<8xf32> to vector<8x1xf32>
    %c0_55 = arith.constant 0 : index
    %c0_56 = arith.constant 0 : index
    %c0_57 = arith.constant 0 : index
    %70 = vector.load %arg6[%c0_55, %c0_56, %c0_57] : memref<1x8x1xf32, #tpu.memory_space<vmem>>, vector<1x8x1xf32>
    %71 = vector.shape_cast %70 : vector<1x8x1xf32> to vector<8x1xf32>
    %72 = vector.shape_cast %60 : vector<8x1xf32> to vector<1x8x1xf32>
    tpu.vector_store %arg6[%c0_55, %c0_56, %c0_57], %72 {strides = array<i32>} : memref<1x8x1xf32, #tpu.memory_space<vmem>>, vector<1x8x1xf32>,
    %c0_58 = arith.constant 0 : index
    %c0_59 = arith.constant 0 : index
    %c0_60 = arith.constant 0 : index
    %73 = vector.load %arg7[%c0_58, %c0_59, %c0_60] : memref<1x8x1xf32, #tpu.memory_space<vmem>>, vector<1x8x1xf32>
    %74 = vector.shape_cast %73 : vector<1x8x1xf32> to vector<8x1xf32>
    %75 = vector.shape_cast %69 : vector<8x1xf32> to vector<1x8x1xf32>
    tpu.vector_store %arg7[%c0_58, %c0_59, %c0_60], %75 {strides = array<i32>} : memref<1x8x1xf32, #tpu.memory_space<vmem>>, vector<1x8x1xf32>,
    return
  }
  func.func @transform_0(%arg0: i32, %arg1: i32) -> (i32, i32, i32) {
    %c0_i32 = arith.constant 0 : i32
    %c0_i32_0 = arith.constant 0 : i32
    %c0_i32_1 = arith.constant 0 : i32
    return %arg0, %c0_i32, %c0_i32_0 : i32, i32, i32
  }
  func.func @transform_1(%arg0: i32, %arg1: i32) -> (i32, i32, i32) {
    %c0_i32 = arith.constant 0 : i32
    %c0_i32_0 = arith.constant 0 : i32
    %c0_i32_1 = arith.constant 0 : i32
    return %c0_i32, %arg1, %c0_i32_0 : i32, i32, i32
  }
  func.func @transform_2(%arg0: i32, %arg1: i32) -> (i32, i32) {
    %c0_i32 = arith.constant 0 : i32
    %c0_i32_0 = arith.constant 0 : i32
    %c0_i32_1 = arith.constant 0 : i32
    return %c0_i32, %c0_i32_0 : i32, i32
  }
  func.func @transform_3(%arg0: i32, %arg1: i32) -> (i32, i32, i32) {
    %c0_i32 = arith.constant 0 : i32
    %c0_i32_0 = arith.constant 0 : i32
    return %arg0, %arg1, %c0_i32 : i32, i32, i32
  }
  func.func @transform_4(%arg0: i32, %arg1: i32) -> (i32, i32, i32) {
    %c0_i32 = arith.constant 0 : i32
    %c0_i32_0 = arith.constant 0 : i32
    return %arg0, %arg1, %c0_i32 : i32, i32, i32
  }
  func.func @transform_5(%arg0: i32, %arg1: i32) -> (i32, i32, i32) {
    %c0_i32 = arith.constant 0 : i32
    %c0_i32_0 = arith.constant 0 : i32
    return %arg0, %arg1, %c0_i32 : i32, i32, i32
  }
}

</mosaic_0001>

<bundles_post_ra>
// kernel: myconv_forward.3
= control target key start
LH: loop header
LB: loop body
LE: loop exit
PB: predicated region body
PF: predicated region fallthrough
CT: control target
= control target key end

     0   :  { %8 = vsyncpa [#allocation3], 0  ;;  %s876_s0 = inlined_call_operand.vmem [shape: f32[2,8,16,18], index: 0, kind: input, shape index: {}]   ;;  %s877_s1 = inlined_call_operand.vmem [shape: f32[8,1,1], index: 1, kind: input, shape index: {}]   ;;  %s878_s2 = inlined_call_operand.vmem [shape: f32[8,1,1], index: 2, kind: input, shape index: {}]   ;;  %s879_s3 = inlined_call_operand.hbm [shape: f32[2,8,16,16], index: 3, kind: output, shape index: {}]  }
   0x1   :  { %10 = vsyncpa [#allocation3 + $0x1], 0  ;;  %s680_s12 = smov 0   ;;  %s682_s13 = smov 0  }
   0x2   :  { %s684_s14 = smov 0   ;;  %s686_s15 = smov 0  }
   0x3 LB: > { %s701_s16 = sadd.s32 4294967295, %s654_s15   ;;  %s518_s17 = sadd.s32 4294967294, %s654_s15   ;;  %s654_s15 = sphi %s686_s15, %s885_s15   ;;  %s650_s14 = sphi %s684_s14, %s884_s14   ;;  %s646_s13 = sphi %s682_s13, %s883_s13   ;;  %s642_s12 = sphi %s680_s12, %s882_s12  }
   0x4   : > { %s705_s18 = sadd.s32 1, %s654_s15   ;;  %s91_s19 = sadd.s32 1, %s650_s14 }
   0x5   : > { %s88_s20 = ssub.s32 %s654_s15, %s705_s18  ;;  %p101_p0 = scmp.ne.s32.totalorder %s650_s14, %s646_s13 }
   0x6   : > { %p89_p1 = scmp.eq.s32.totalorder %s88_s20, 0  ;;  %p102_p2 = scmp.eq.s32.totalorder %s701_s16, 1 }
   0x7   : > { %p107_p3 = scmp.ne.s32.totalorder %s646_s13, %s642_s12  ;;  %p108_p4 = scmp.eq.s32.totalorder %s518_s17, 1 }
   0x8   : > { %s716_s21 = scalar_select %p89_p1, %s650_s14, %s91_s19  }
   0x9   : > { %p718_p5 = por %p102_p2, %p101_p0  ;;  %p722_p6 = por %p108_p4, %p107_p3 }
   0xa   : > { %p521_p7 = scmp.ge.s32.totalorder %s654_s15, 1  ;;  %p140_p8 = scmp.lt.s32.totalorder %s654_s15, 3 }
   0xc   : > { %p141_p9 = pnand %p521_p7, %p140_p8 }
   0xd   : > { %v527_v0 = vld [vmem:[%s877_s1 + $0x2] ss:$0 sm:$0xff] (!%p141_p9)  ;;  %v525_v1 = vld [vmem:[%s877_s1] ss:$0 sm:$0xff] (!%p141_p9)  ;;  %v656_v2 = vmov (!%p141_p9), 0   ;;  %p164_p10 = scmp.lt.s32.totalorder (!%p141_p9), %s701_s16, 1 }
   0xe   : > { %144 = sbr.rel (%p141_p9) target bundleno = 194 (0xc2), region = 32  ;;  %591 = vset.pattern.permute.xlu1 (!%p141_p9), %v656_v2  ;;  %590 = vset.pattern.permute.xlu0 (!%p141_p9), %v656_v2  ;;  %v528_v3 = vld [vmem:[%s877_s1 + $0x3] ss:$0 sm:$0xff] (!%p141_p9)  ;;  %v526_v4 = vld [vmem:[%s877_s1 + $0x1] ss:$0 sm:$0xff] (!%p141_p9)  ;;  %s161_s25 = sand.u32 (!%p141_p9), 1, %s646_s13  }
   0xf   : > { %242 = vperm.xlu1 (!%p141_p9), %591, %v527_v0   ;;  %234 = vperm.xlu0 (!%p141_p9), %590, %v525_v1   ;;  %v530_v5 = vld [vmem:[%s877_s1 + $0x5] ss:$0 sm:$0xff] (!%p141_p9)  ;;  %v529_v6 = vld [vmem:[%s877_s1 + $0x4] ss:$0 sm:$0xff] (!%p141_p9)  ;;  %v532_v7 = vld [vmem:[%s877_s1 + $0x7] ss:$0 sm:$0xff] (!%p141_p9) }
  0x10   : > { %v531_v8 = vld [vmem:[%s877_s1 + $0x6] ss:$0 sm:$0xff] (!%p141_p9)  ;;  %v534_v9 = vld [vmem:[%s878_s2 + $0x1] ss:$0 sm:$0xff] (!%p141_p9)  ;;  %v533_v10 = vld [vmem:[%s878_s2] ss:$0 sm:$0xff] (!%p141_p9) }
  0x11   : > { %v536_v11 = vld [vmem:[%s878_s2 + $0x3] ss:$0 sm:$0xff] (!%p141_p9)  ;;  %v535_v12 = vld [vmem:[%s878_s2 + $0x2] ss:$0 sm:$0xff] (!%p141_p9)  ;;  %v538_v13 = vld [vmem:[%s878_s2 + $0x5] ss:$0 sm:$0xff] (!%p141_p9) }
  0x12   : > { %v537_v14 = vld [vmem:[%s878_s2 + $0x4] ss:$0 sm:$0xff] (!%p141_p9)  ;;  %v540_v15 = vld [vmem:[%s878_s2 + $0x7] ss:$0 sm:$0xff] (!%p141_p9)  ;;  %v539_v16 = vld [vmem:[%s878_s2 + $0x6] ss:$0 sm:$0xff] (!%p141_p9) }
  0x13   : > { %246 = vperm.xlu1 (!%p141_p9), %591, %v528_v3   ;;  %238 = vperm.xlu0 (!%p141_p9), %590, %v526_v4   ;;  %vm425_vm0 = vcmask (!%p141_p9), 130048   ;;  %s522_s26 = sshll.u32 (!%p141_p9), %s161_s25, 7  ;;  %s547_s28 = sshll.u32 (!%p141_p9), %s701_s16, 11 }
  0x14   : > { %s788_s27 = scalar_lea.vmem (!%p141_p9), [#allocation2], %s522_s26  ;;  %s821_s4 = scalar_lea.hbm (!%p141_p9), %s879_s3, %s547_s28 }
  0x15   : > { %s165_s11 = scalar_select %p164_p10, %s701_s16, 1 }
  0x16   : > { %s456_s29 = sshll.u32 %s788_s27, 4  ;;  %s835_s5 = scalar_lea.sflag [#allocation3], %s161_s25  ;;  %s823_s29 = int_to_ptr.vmem [resolvable:$true] %s456_s29 }
  0x17   : > { %254 = vperm.xlu1 %591, %v530_v5   ;;  %250 = vperm.xlu0 %590, %v529_v6   ;;  %s546_s17 = sshll.u32 %s165_s11, 7  ;;  %s592_s6 = scalar_lea.vmem %s823_s29, 2048 }
  0x18   : > { %s168_s24 = scalar_lea.vmem %s876_s0, %s546_s17  ;;  %p593_p11 = scmp.ne.s32.totalorder %s823_s29, %s592_s6 }
  0x19   : > { %v173_v23 = vld [vmem:[%s168_s24 + $0x20] sm:$0xff]  ;;  %v174_v24 = vld [vmem:[%s168_s24 + $0x28] sm:$0xff]  ;;  %v175_v27 = vld [vmem:[%s168_s24 + $0x30] sm:$0xff]  ;;  %s657_s7 = smov [#allocation2]  }
  0x1a   : > { %v169_v25 = vld [vmem:[%s168_s24] sm:$0xff]  ;;  %v170_v26 = vld [vmem:[%s168_s24 + $0x8] sm:$0xff]  ;;  %v176_v28 = vld [vmem:[%s168_s24 + $0x38] sm:$0xff]  ;;  %p594_p12 = pnand %p593_p11, %p718_p5  ;;  %s596_s8 = sshll.u32 %s657_s7, 4  ;;  %s597_s8 = int_to_ptr.vmem [resolvable:$false] %s596_s8 }
  0x1b   : > { %262 = vperm.xlu1 %591, %v532_v7   ;;  %258 = vperm.xlu0 %590, %v531_v8   ;;  %v171_v29 = vld [vmem:[%s168_s24 + $0x10] sm:$0xff]  ;;  %v172_v30 = vld [vmem:[%s168_s24 + $0x18] sm:$0xff]  ;;  %v177_v35 = vld [vmem:[%s168_s24 + $0x40] sm:$0xff]  ;;  %s598_s9 = scalar_lea.vmem %s597_s8, 4096  ;;  %p599_p0 = scmp.lt.s32.totalorder %s823_s29, %s597_s8 }
  0x1c   : > { %v179_v31 = vld [vmem:[%s168_s24 + $0x50] sm:$0xff]  ;;  %v180_v34 = vld [vmem:[%s168_s24 + $0x58] sm:$0xff]  ;;  %v178_v36 = vld [vmem:[%s168_s24 + $0x48] sm:$0xff]  ;;  %p595_p13 = pneg %p594_p12  ;;  %p600_p1 = scmp.lt.s32.totalorder %s598_s9, %s592_s6 }
  0x1d   : > { %v183_v41 = vld [vmem:[%s168_s24 + $0x70] sm:$0xff]  ;;  %v184_v46 = vld [vmem:[%s168_s24 + $0x78] sm:$0xff]  ;;  %v181_v47 = vld [vmem:[%s168_s24 + $0x60] sm:$0xff] }
  0x1e   : > { %v182_v48 = vld [vmem:[%s168_s24 + $0x68] sm:$0xff]  ;;  %p601_p2 = por %p600_p1, %p599_p0 }
  0x1f   : > { %334 = vperm.xlu1 %591, %v534_v9   ;;  %330 = vperm.xlu0 %590, %v533_v10  }
  0x20   : > { %p602_p3 = pnand %p601_p2, %p595_p13 }
  0x23   : > { %342 = vperm.xlu1 %591, %v536_v11   ;;  %338 = vperm.xlu0 %590, %v535_v12  }
  0x27   : > { %350 = vperm.xlu1 %591, %v538_v13   ;;  %346 = vperm.xlu0 %590, %v537_v14  }
  0x2b   : > { %358 = vperm.xlu1 %591, %v540_v15   ;;  %354 = vperm.xlu0 %590, %v539_v16  }
  0x8e   : > { %v243_v17 = vpop.permute.xlu1 %242  ;;  %v235_v18 = vpop.permute.xlu0 %234 }
  0x8f   : > { %v269_v37 = vmul.f32 %v243_v17, %v173_v23  ;;  %v270_v38 = vmul.f32 %v243_v17, %v174_v24  ;;  %v265_v39 = vmul.f32 %v235_v18, %v169_v25  ;;  %v266_v40 = vmul.f32 %v235_v18, %v170_v26 }
  0x92   : > { %v247_v19 = vpop.permute.xlu1 %246  ;;  %v239_v20 = vpop.permute.xlu0 %238 }
  0x93   : > { %v271_v42 = vmul.f32 %v247_v19, %v175_v27  ;;  %v272_v43 = vmul.f32 %v247_v19, %v176_v28  ;;  %v267_v44 = vmul.f32 %v239_v20, %v171_v29  ;;  %v268_v45 = vmul.f32 %v239_v20, %v172_v30 }
  0x96   : > { %v255_v21 = vpop.permute.xlu1 %254  ;;  %v251_v22 = vpop.permute.xlu0 %250 }
  0x97   : > { %v275_v49 = vmul.f32 %v255_v21, %v179_v31  ;;  %v276_v50 = vmul.f32 %v255_v21, %v180_v34  ;;  %v273_v51 = vmul.f32 %v251_v22, %v177_v35  ;;  %v274_v52 = vmul.f32 %v251_v22, %v178_v36 }
  0x9a   : > { %v263_v32 = vpop.permute.xlu1 %262  ;;  %v259_v33 = vpop.permute.xlu0 %258 }
  0x9b   : > { %v279_v59 = vmul.f32 %v263_v32, %v183_v41  ;;  %v280_v60 = vmul.f32 %v263_v32, %v184_v46  ;;  %v784_v61 = vmul.f32 %v259_v33, %v181_v47  ;;  %v786_v62 = vmul.f32 %v259_v33, %v182_v48 }
  0x9e   : > { %v335_v53 = vpop.permute.xlu1 %334  ;;  %v331_v54 = vpop.permute.xlu0 %330 }
  0x9f   : > { %v363_v55 = vadd.f32 %v335_v53, %v267_v44  ;;  %v364_v56 = vadd.f32 %v335_v53, %v268_v45  ;;  %v361_v57 = vadd.f32 %v331_v54, %v265_v39  ;;  %v362_v58 = vadd.f32 %v331_v54, %v266_v40 }
  0xa1   : > { %vm379_vm1 = vcmp.ge.f32.partialorder %v363_v55, 0.0  ;;  %vm380_vm2 = vcmp.ge.f32.partialorder %v364_v56, 0.0  ;;  %v395_v63 = vmul.f32 0.2, %v363_v55  ;;  %v396_v0 = vmul.f32 0.2, %v364_v56 }
  0xa2   : > { %vm377_vm3 = vcmp.ge.f32.partialorder %v361_v57, 0.0  ;;  %vm378_vm4 = vcmp.ge.f32.partialorder %v362_v58, 0.0  ;;  %v393_v1 = vmul.f32 0.2, %v361_v57  ;;  %v394_v2 = vmul.f32 0.2, %v362_v58  ;;  %v343_v3 = vpop.permute.xlu1 %342  ;;  %v339_v4 = vpop.permute.xlu0 %338 }
  0xa3   : > { %v411_v5 = vsel %vm379_vm1, %v363_v55, %v395_v63  ;;  %v412_v6 = vsel %vm380_vm2, %v364_v56, %v396_v0  ;;  %v367_v7 = vadd.f32 %v343_v3, %v271_v42  ;;  %v368_v8 = vadd.f32 %v343_v3, %v272_v43 }
  0xa4   : > { %428 = vst.msk [vmem:[%s788_s27 + $0x10] sm:$0xff] %vm425_vm0, %v411_v5  ;;  %429 = vst.msk [vmem:[%s788_s27 + $0x18] sm:$0xff] %vm425_vm0, %v412_v6  ;;  %v409_v9 = vsel %vm377_vm3, %v361_v57, %v393_v1  ;;  %v410_v10 = vsel %vm378_vm4, %v362_v58, %v394_v2  ;;  %v365_v11 = vadd.f32 %v339_v4, %v269_v37 }
  0xa5   : > { %v366_v12 = vadd.f32 %v339_v4, %v270_v38  ;;  %426 = vst.msk [vmem:[%s788_s27] sm:$0xff] %vm425_vm0, %v409_v9  ;;  %427 = vst.msk [vmem:[%s788_s27 + $0x8] sm:$0xff] %vm425_vm0, %v410_v10  ;;  %vm383_vm5 = vcmp.ge.f32.partialorder %v367_v7, 0.0  ;;  %vm384_vm6 = vcmp.ge.f32.partialorder %v368_v8, 0.0  ;;  %v399_v13 = vmul.f32 0.2, %v367_v7 }
  0xa6   : > { %v400_v14 = vmul.f32 0.2, %v368_v8  ;;  %vm381_vm7 = vcmp.ge.f32.partialorder %v365_v11, 0.0  ;;  %v397_v15 = vmul.f32 0.2, %v365_v11  ;;  %v351_v17 = vpop.permute.xlu1 %350  ;;  %v347_v18 = vpop.permute.xlu0 %346 }
  0xa7   : > { %vm382_vm8 = vcmp.ge.f32.partialorder %v366_v12, 0.0  ;;  %v398_v16 = vmul.f32 0.2, %v366_v12  ;;  %v415_v19 = vsel %vm383_vm5, %v367_v7, %v399_v13  ;;  %v371_v21 = vadd.f32 %v351_v17, %v275_v49 }
  0xa8   : > { %v416_v20 = vsel %vm384_vm6, %v368_v8, %v400_v14  ;;  %v372_v22 = vadd.f32 %v351_v17, %v276_v50  ;;  %432 = vst.msk [vmem:[%s788_s27 + $0x30] sm:$0xff] %vm425_vm0, %v415_v19  ;;  %v413_v23 = vsel %vm381_vm7, %v365_v11, %v397_v15  ;;  %v369_v25 = vadd.f32 %v347_v18, %v273_v51 }
  0xa9   : > { %433 = vst.msk [vmem:[%s788_s27 + $0x38] sm:$0xff] %vm425_vm0, %v416_v20  ;;  %v414_v24 = vsel %vm382_vm8, %v366_v12, %v398_v16  ;;  %v370_v26 = vadd.f32 %v347_v18, %v274_v52  ;;  %430 = vst.msk [vmem:[%s788_s27 + $0x20] sm:$0xff] %vm425_vm0, %v413_v23  ;;  %vm387_vm9 = vcmp.ge.f32.partialorder %v371_v21, 0.0  ;;  %v403_v27 = vmul.f32 0.2, %v371_v21 }
  0xaa   : > { %431 = vst.msk [vmem:[%s788_s27 + $0x28] sm:$0xff] %vm425_vm0, %v414_v24  ;;  %vm388_vm10 = vcmp.ge.f32.partialorder %v372_v22, 0.0  ;;  %v404_v28 = vmul.f32 0.2, %v372_v22  ;;  %vm385_vm11 = vcmp.ge.f32.partialorder %v369_v25, 0.0  ;;  %v359_v31 = vpop.permute.xlu1 %358  ;;  %v355_v32 = vpop.permute.xlu0 %354 }
  0xab   : > { %vm386_vm12 = vcmp.ge.f32.partialorder %v370_v26, 0.0  ;;  %v401_v29 = vmul.f32 0.2, %v369_v25  ;;  %v402_v30 = vmul.f32 0.2, %v370_v26  ;;  %v419_v33 = vsel %vm387_vm9, %v371_v21, %v403_v27 }
  0xac   : > { %v420_v34 = vsel %vm388_vm10, %v372_v22, %v404_v28  ;;  %v375_v35 = vadd.f32 %v359_v31, %v279_v59  ;;  %v376_v36 = vadd.f32 %v359_v31, %v280_v60  ;;  %436 = vst.msk [vmem:[%s788_s27 + $0x50] sm:$0xff] %vm425_vm0, %v419_v33  ;;  %v373_v39 = vadd.f32 %v355_v32, %v784_v61 }
  0xad   : > { %437 = vst.msk [vmem:[%s788_s27 + $0x58] sm:$0xff] %vm425_vm0, %v420_v34  ;;  %v417_v37 = vsel %vm385_vm11, %v369_v25, %v401_v29  ;;  %v418_v38 = vsel %vm386_vm12, %v370_v26, %v402_v30  ;;  %v374_v40 = vadd.f32 %v355_v32, %v786_v62 }
  0xae   : > { %434 = vst.msk [vmem:[%s788_s27 + $0x40] sm:$0xff] %vm425_vm0, %v417_v37  ;;  %435 = vst.msk [vmem:[%s788_s27 + $0x48] sm:$0xff] %vm425_vm0, %v418_v38  ;;  %vm391_vm13 = vcmp.ge.f32.partialorder %v375_v35, 0.0  ;;  %vm392_vm14 = vcmp.ge.f32.partialorder %v376_v36, 0.0  ;;  %v407_v41 = vmul.f32 0.2, %v375_v35 }
  0xaf   : > { %v408_v42 = vmul.f32 0.2, %v376_v36  ;;  %vm389_vm15 = vcmp.ge.f32.partialorder %v373_v39, 0.0  ;;  %vm390_vm1 = vcmp.ge.f32.partialorder %v374_v40, 0.0  ;;  %v405_v43 = vmul.f32 0.2, %v373_v39 }
  0xb0   : > { %v406_v44 = vmul.f32 0.2, %v374_v40  ;;  %v423_v45 = vsel %vm391_vm13, %v375_v35, %v407_v41 }
  0xb1   : > { %v424_v46 = vsel %vm392_vm14, %v376_v36, %v408_v42  ;;  %440 = vst.msk [vmem:[%s788_s27 + $0x70] sm:$0xff] %vm425_vm0, %v423_v45  ;;  %v421_v47 = vsel %vm389_vm15, %v373_v39, %v405_v43 }
  0xb2   : > { %441 = vst.msk [vmem:[%s788_s27 + $0x78] sm:$0xff] %vm425_vm0, %v424_v46  ;;  %v422_v48 = vsel %vm390_vm1, %v374_v40, %v406_v44  ;;  %438 = vst.msk [vmem:[%s788_s27 + $0x60] sm:$0xff] %vm425_vm0, %v421_v47 }
  0xb3   : > { %439 = vst.msk [vmem:[%s788_s27 + $0x68] sm:$0xff] %vm425_vm0, %v422_v48 }
  0xb4   : > { %605 = shalt.err (!%p602_p3)
}
  0xb5   : > { %s606_s10 = scalar_lea.hbm %s821_s4, 2048  ;;  %s610_s19 = scalar_lea.hbm %s879_s3, 4096 }
  0xb6   : > { %p607_p4 = scmp.ne.s32.totalorder %s821_s4, %s606_s10  ;;  %p611_p9 = scmp.lt.u32.totalorder %s821_s4, %s879_s3 }
  0xb7   : > { %p612_p10 = scmp.lt.u32.totalorder %s610_s19, %s606_s10  ;;  %p614_p12 = scmp.lt.u32.totalorder %s606_s10, %s821_s4 }
  0xb8   : > { %p608_p7 = pnand %p607_p4, %p718_p5 }
  0xb9   : > { %p613_p11 = por %p612_p10, %p611_p9 }
  0xba   : > { %p609_p8 = pneg %p608_p7 }
  0xbb   : > { %p615_p13 = por %p614_p12, %p613_p11 }
  0xbd   : > { %p616_p0 = pnand %p615_p13, %p609_p8 }
  0xbf   : > { %619 = shalt.err (!%p616_p0)
}
  0xc0   : > { %s658_s25 = smov 128   ;;  %s659_s26 = smov 8  }
  0xc1   : > { %548 = dma.vmem_to_hbm [thread:$0]  (%p718_p5), %s823_s29, 2048, %s821_s4, %s835_s5, %s658_s25, %s658_s25, %s659_s26  }
  0xc2 PF: > { %p554_p1 = scmp.ge.s32.totalorder %s654_s15, 2  ;;  %s471_s27 = sand.u32 1, %s642_s12  }
  0xc3   : > { %s472_s28 = scalar_lea.sflag [#allocation3], %s471_s27 }
  0xc4   : > { %p551_p2 = pnand %p554_p1, %p722_p6 }
  0xc6   : > { %637 = dma.done.wait (!%p551_p2), %s472_s28, 2048  }
  0xc7   : > { %639 = vsyncadd (!%p551_p2), %s472_s28, 4294965248  ;;  %p13_p3 = scmp.ge.s32.totalorder %s705_s18, 4   ;;  %s882_s12 = smov %s646_s13 }
  0xc8   : > { %s883_s13 = smov %s650_s14  ;;  %s884_s14 = smov %s716_s21 }
  0xc9   : > { %s885_s15 = smov %s705_s18  ;;  %15 = sbr.rel (!%p13_p3) target bundleno = 3 (0x3), region = 67 }
  0xd0   :  { %477 = vsyncpa [#allocation3], 1 }
  0xd1   :  { %479 = vsyncpa [#allocation3 + $0x1], 1 }

// kernel: myconv_forward.2
= control target key start
LH: loop header
LB: loop body
LE: loop exit
PB: predicated region body
PF: predicated region fallthrough
CT: control target
= control target key end

     0   :  { %s2292_s18 = smov 0   ;;  %s2294_s19 = smov 0   ;;  %s2475_s0 = inlined_call_operand.vmem [shape: f32[2,4,384], index: 0, kind: input, shape index: {}]   ;;  %s2476_s1 = inlined_call_operand.vmem [shape: f32[9,8,4], index: 1, kind: input, shape index: {}]   ;;  %s2477_s2 = inlined_call_operand.vmem [shape: f32[1,288], index: 2, kind: input, shape index: {}]   ;;  %s2478_s3 = inlined_call_operand.vmem [shape: f32[2,8,288], index: 3, kind: output, shape index: {0}]   ;;  %s2479_s4 = inlined_call_operand.vmem [shape: f32[2,8,1], index: 4, kind: output, shape index: {1}]   ;;  %s2480_s5 = inlined_call_operand.vmem [shape: f32[2,8,1], index: 5, kind: output, shape index: {2}]  }
   0x1   :  { %s2296_s20 = smov 0  }
   0x2 LB: > { %s28_s21 = sadd.s32 1, %s2246_s19  ;;  %p2036_p0 = scmp.ge.s32.totalorder %s2250_s20, 1  ;;  %s2250_s20 = sphi %s2296_s20, %s16_s20   ;;  %s2246_s19 = sphi %s2294_s19, %s2482_s19   ;;  %s2242_s18 = sphi %s2292_s18, %s2481_s18  }
   0x3   : > { %p30_p1 = scmp.ge.s32.totalorder %s28_s21, 2  ;;  %p219_p2 = scmp.lt.s32.totalorder %s2250_s20, 3 }
   0x5   : > { %s2484_s21 = smov (%p30_p1, %s28_s21), 0  ;;  %p220_p3 = pnand %p2036_p0, %p219_p2 }
   0x6   : > { %p269_p4 = scmp.lt.s32.totalorder (!%p220_p3), %s2242_s18, 1  ;;  %v2252_v0 = vmov (!%p220_p3), 0.0   ;;  %vm2253_vm0 = vmmov (!%p220_p3), 0   ;;  %s2254_s26 = smov (!%p220_p3), 127   ;;  %vm322_vm1 = vcmask (!%p220_p3), 1043456   ;;  %vm315_vm2 = vcmask (!%p220_p3), 1039360  }
   0x7   : > { %223 = sbr.rel (%p220_p3) target bundleno = 723 (0x2d3), region = 32  ;;  %2114 = vmatprep.subr.mxu1 (!%p220_p3), %v2252_v0  ;;  %2116 = vmatprep.mubr.msk.f32.mxu1 (!%p220_p3), %vm2253_vm0, %v2252_v0  ;;  %s2255_s27 = smov (!%p220_p3), 126   ;;  %v2041_v14 = vld [vmem:[%s2476_s1 + $0x8] sm:$0xff] (!%p220_p3)  ;;  %vm318_vm3 = vcmask (!%p220_p3), 31744   ;;  %vm633_vm4 = vcmask (!%p220_p3), 1031168   ;;  %v303_v21 = vld [vmem:[%s2476_s1] sm:$0xff] (!%p220_p3)  ;;  %v1809_v60 = vlaneseq (!%p220_p3) }
   0x8   : > { %393 = vmatprep.mubr.f32.mxu0 (!%p220_p3), %v2252_v0  ;;  %s2256_s28 = smov (!%p220_p3), 110   ;;  %s2257_s29 = smov (!%p220_p3), 109   ;;  %vm802_vm5 = vcmask (!%p220_p3), 900096   ;;  %v2052_v28 = vld [vmem:[%s2476_s1 + $0x10] sm:$0xff] (!%p220_p3)  ;;  %vm971_vm6 = vcmask (!%p220_p3), 891904   ;;  %v2058_v34 = vld [vmem:[%s2476_s1 + $0x18] sm:$0xff] (!%p220_p3) }
   0x9   : > { %s2258_s30 = smov (!%p220_p3), 108   ;;  %s2259_s6 = smov (!%p220_p3), 92   ;;  %vm1140_vm7 = vcmask (!%p220_p3), 883712   ;;  %v2064_v40 = vld [vmem:[%s2476_s1 + $0x20] sm:$0xff] (!%p220_p3)  ;;  %vm1309_vm8 = vcmask (!%p220_p3), 752640   ;;  %v2070_v46 = vld [vmem:[%s2476_s1 + $0x28] sm:$0xff] (!%p220_p3) }
   0xa   : > { %s2260_s7 = smov (!%p220_p3), 91   ;;  %s2261_s8 = smov (!%p220_p3), 90   ;;  %vm1478_vm9 = vcmask (!%p220_p3), 744448   ;;  %v2076_v51 = vld [vmem:[%s2476_s1 + $0x30] sm:$0xff] (!%p220_p3)  ;;  %vm1647_vm10 = vcmask (!%p220_p3), 736256   ;;  %v2082_v57 = vld [vmem:[%s2476_s1 + $0x38] sm:$0xff] (!%p220_p3) }
   0xb   : > { %v2088_v59 = vld [vmem:[%s2476_s1 + $0x40] sm:$0xff] (!%p220_p3)  ;;  %v1810_v61 = vshrl.u32 (!%p220_p3), %v1809_v60, 7  ;;  %vm1805_vm11 = vcmask (!%p220_p3), 261120   ;;  %vm1847_vm12 = vcmask (!%p220_p3), 7168  }
   0xd   : > { %v1819_v62 = vsub.s32 (!%p220_p3), 2, %v1810_v61  ;;  %v1811_v63 = vsub.s32 (!%p220_p3), 0, %v1810_v61 }
   0xe   : > { %s2486_s18 = smov (!%p269_p4, %s2242_s18), 1 }
   0xf   : > { %s2191_s22 = smul.u32 12, %s2486_s18  ;;  %s2039_s12 = sshll.u32 %s2486_s18, 3 }
  0x10   : > { %s293_s15 = scalar_lea.vmem %s2479_s4, %s2039_s12  ;;  %s300_s17 = scalar_lea.vmem %s2480_s5, %s2039_s12 }
  0x11   : > { %s2320_s25 = scalar_lea.vmem %s2475_s0, %s2191_s22 }
  0x12   : > { %v301_v1 = vld [vmem:[%s2320_s25] sm:$0xff]  ;;  %v302_v3 = vld [vmem:[%s2320_s25 + $0x8] sm:$0xf] }
  0x13   : > { %309 = vrot.lane.b32.xlu1 %v301_v1, %s2254_s26  ;;  %v308_v2 = vcombine.high %v301_v1, %v301_v1  ;;  %v621_v4 = vld [vmem:[%s2320_s25 + $0x8] sm:$0xf] }
  0x14   : > { %v790_v5 = vld [vmem:[%s2320_s25 + $0x8] sm:$0xf] }
  0x15   : > { %311 = vrot.lane.b32.xlu0 %v308_v2, %s2254_s26  ;;  %v959_v6 = vld [vmem:[%s2320_s25 + $0x8] sm:$0xf] }
  0x16   : > { %v1128_v7 = vld [vmem:[%s2320_s25 + $0x8] sm:$0xf] }
  0x17   : > { %629 = vrot.lane.b32.xlu1 %v308_v2, %s2255_s27  ;;  %v1297_v8 = vld [vmem:[%s2320_s25 + $0x8] sm:$0xf] }
  0x18   : > { %v1466_v9 = vld [vmem:[%s2320_s25 + $0x8] sm:$0xf] }
  0x19   : > { %313 = vrot.lane.b32.xlu0 %v302_v3, %s2254_s26  ;;  %v1635_v10 = vld [vmem:[%s2320_s25 + $0x8] sm:$0xf] }
  0x1b   : > { %627 = vrot.lane.b32.xlu1 %v301_v1, %s2255_s27 }
  0x1d   : > { %631 = vrot.lane.b32.xlu0 %v621_v4, %s2255_s27 }
  0x1f   : > { %800 = vrot.lane.b32.xlu1 %v790_v5, %s2256_s28 }
  0x21   : > { %798 = vrot.lane.b32.xlu0 %v308_v2, %s2256_s28 }
  0x23   : > { %967 = vrot.lane.b32.xlu1 %v308_v2, %s2257_s29 }
  0x25   : > { %796 = vrot.lane.b32.xlu0 %v301_v1, %s2256_s28 }
  0x27   : > { %965 = vrot.lane.b32.xlu1 %v301_v1, %s2257_s29 }
  0x29   : > { %969 = vrot.lane.b32.xlu0 %v959_v6, %s2257_s29 }
  0x2b   : > { %1138 = vrot.lane.b32.xlu1 %v1128_v7, %s2258_s30 }
  0x2d   : > { %1136 = vrot.lane.b32.xlu0 %v308_v2, %s2258_s30 }
  0x2f   : > { %1305 = vrot.lane.b32.xlu1 %v308_v2, %s2259_s6 }
  0x31   : > { %1134 = vrot.lane.b32.xlu0 %v301_v1, %s2258_s30 }
  0x33   : > { %1303 = vrot.lane.b32.xlu1 %v301_v1, %s2259_s6 }
  0x35   : > { %1307 = vrot.lane.b32.xlu0 %v1297_v8, %s2259_s6  ;;  %s2192_s6 = smul.u32 24, %s2486_s18 }
  0x37   : > { %1476 = vrot.lane.b32.xlu1 %v1466_v9, %s2260_s7  ;;  %s286_s11 = scalar_lea.vmem %s2478_s3, %s2192_s6 }
  0x39   : > { %1474 = vrot.lane.b32.xlu0 %v308_v2, %s2260_s7 }
  0x3b   : > { %1643 = vrot.lane.b32.xlu1 %v308_v2, %s2261_s8 }
  0x3d   : > { %1472 = vrot.lane.b32.xlu0 %v301_v1, %s2260_s7 }
  0x3f   : > { %1641 = vrot.lane.b32.xlu1 %v301_v1, %s2261_s8 }
  0x41   : > { %1645 = vrot.lane.b32.xlu0 %v1635_v10, %s2261_s8 }
  0x85   : > { %v310_v11 = vpop.permute.xlu1 %309 }
  0x87   : > { %v312_v12 = vpop.permute.xlu0 %311 }
  0x88   : > { %v316_v17 = vsel %vm315_vm2, %v310_v11, %v312_v12 }
  0x89   : > { %v630_v13 = vpop.permute.xlu1 %629 }
  0x8b   : > { %v314_v15 = vpop.permute.xlu0 %313 }
  0x8c   : > { %2115 = vmatpush3.msk.msra.mxu1 %vm322_vm1, %v314_v15  ;;  %v317_v16 = vsel %vm315_vm2, %v312_v12, %v314_v15 }
  0x8d   : > { %2042 = vmatprep.subr.msk.mxu0 %vm322_vm1, %v317_v16  ;;  %2117 = vmatmul.mubr.msk.f32.vlgmr.msra.gmra.mrb[0].mxu1 %vm318_vm3, %v2041_v14  ;;  %v628_v18 = vpop.permute.xlu1 %627 }
  0x8e   : > { %2043 = vmatpush1.msk.msra.mxu0 %vm322_vm1, %v316_v17  ;;  %2119 = vmatprep.subr.mxu1 %v2252_v0  ;;  %v634_v24 = vsel %vm633_vm4, %v628_v18, %v630_v13 }
  0x8f   : > { %2044 = vmatmul.mubr.msk.f32.vlgmr.msra.gmra.mrb[0].mxu0 %vm318_vm3, %v2041_v14  ;;  %2047 = vmatprep.subr.msk.mxu0 %vm322_vm1, %v308_v2  ;;  %v632_v19 = vpop.permute.xlu0 %631  ;;  %v1815_v2 = vsub.s32 1, %v1810_v61 }
  0x90   : > { %2048 = vmatpush1.msk.msra.mxu0 %vm322_vm1, %v301_v1  ;;  %2120 = vmatpush3.msk.msra.mxu1 %vm322_vm1, %v302_v3  ;;  %v635_v20 = vsel %vm633_vm4, %v630_v13, %v632_v19  ;;  %v1807_v1 = vld [vmem:[%s2477_s2] sm:$0x7] }
  0x91   : > { %2121 = vmatprep.mubr.msk.f32.mxu1 %vm2253_vm0, %v2252_v0  ;;  %2053 = vmatprep.subr.msk.mxu0 %vm322_vm1, %v635_v20  ;;  %v801_v23 = vpop.permute.xlu1 %800  ;;  %v1812_v3 = vrot.slane %v1807_v1, %v1811_v63  ;;  %v1816_v5 = vrot.slane %v1807_v1, %v1815_v2 }
  0x92   : > { %2124 = vmatprep.subr.mxu1 %v2252_v0  ;;  %543 = vmatprep.mubr.f32.mxu0 %v2252_v0 }
  0x93   : > { %v799_v22 = vpop.permute.xlu0 %798 }
  0x94   : > { %v804_v25 = vsel %vm802_vm5, %v799_v22, %v801_v23 }
  0x95   : > { %2122 = vmatmul.mubr.msk.f32.vlgmr.msra.gmra.mrb[0].mxu1 %vm318_vm3, %v303_v21  ;;  %v968_v27 = vpop.permute.xlu1 %967 }
  0x96   : > { %2125 = vmatpush3.msk.msra.mxu1 %vm322_vm1, %v632_v19  ;;  %2126 = vmatprep.mubr.msk.f32.mxu1 %vm2253_vm0, %v2252_v0 }
  0x97   : > { %2049 = vmatmul.mubr.msk.f32.vlgmr.msra.gmra.mrb[0].mxu0 %vm318_vm3, %v303_v21  ;;  %v797_v26 = vpop.permute.xlu0 %796  ;;  %2129 = vmatprep.subr.mxu1 %v2252_v0 }
  0x98   : > { %2054 = vmatpush1.msk.msra.mxu0 %vm322_vm1, %v634_v24  ;;  %709 = vmatprep.mubr.f32.mxu0 %v2252_v0  ;;  %v803_v30 = vsel %vm802_vm5, %v797_v26, %v799_v22 }
  0x99   : > { %2059 = vmatprep.subr.msk.mxu0 %vm322_vm1, %v804_v25  ;;  %v966_v32 = vpop.permute.xlu1 %965 }
  0x9a   : > { %v972_v36 = vsel %vm971_vm6, %v966_v32, %v968_v27 }
  0x9b   : > { %v970_v29 = vpop.permute.xlu0 %969 }
  0x9c   : > { %v973_v31 = vsel %vm971_vm6, %v968_v27, %v970_v29 }
  0x9d   : > { %2127 = vmatmul.mubr.msk.f32.vlgmr.msra.gmra.mrb[0].mxu1 %vm318_vm3, %v2052_v28  ;;  %v1139_v35 = vpop.permute.xlu1 %1138 }
  0x9e   : > { %2130 = vmatpush3.msk.msra.mxu1 %vm322_vm1, %v801_v23  ;;  %2131 = vmatprep.mubr.msk.f32.mxu1 %vm2253_vm0, %v2252_v0 }
  0x9f   : > { %2055 = vmatmul.mubr.msk.f32.vlgmr.msra.gmra.mrb[0].mxu0 %vm318_vm3, %v2052_v28  ;;  %2134 = vmatprep.subr.mxu1 %v2252_v0  ;;  %v1137_v33 = vpop.permute.xlu0 %1136 }
  0xa0   : > { %2060 = vmatpush1.msk.msra.mxu0 %vm322_vm1, %v803_v30  ;;  %878 = vmatprep.mubr.f32.mxu0 %v2252_v0  ;;  %v1142_v37 = vsel %vm1140_vm7, %v1137_v33, %v1139_v35 }
  0xa1   : > { %2065 = vmatprep.subr.msk.mxu0 %vm322_vm1, %v973_v31  ;;  %v1306_v39 = vpop.permute.xlu1 %1305 }
  0xa3   : > { %v1135_v38 = vpop.permute.xlu0 %1134 }
  0xa4   : > { %v1141_v42 = vsel %vm1140_vm7, %v1135_v38, %v1137_v33 }
  0xa5   : > { %2132 = vmatmul.mubr.msk.f32.vlgmr.msra.gmra.mrb[0].mxu1 %vm318_vm3, %v2058_v34  ;;  %v1304_v44 = vpop.permute.xlu1 %1303 }
  0xa6   : > { %2135 = vmatpush3.msk.msra.mxu1 %vm322_vm1, %v970_v29  ;;  %2136 = vmatprep.mubr.msk.f32.mxu1 %vm2253_vm0, %v2252_v0  ;;  %v1310_v48 = vsel %vm1309_vm8, %v1304_v44, %v1306_v39 }
  0xa7   : > { %2061 = vmatmul.mubr.msk.f32.vlgmr.msra.gmra.mrb[0].mxu0 %vm318_vm3, %v2058_v34  ;;  %2139 = vmatprep.subr.mxu1 %v2252_v0  ;;  %v1308_v41 = vpop.permute.xlu0 %1307 }
  0xa8   : > { %2066 = vmatpush1.msk.msra.mxu0 %vm322_vm1, %v972_v36  ;;  %1047 = vmatprep.mubr.f32.mxu0 %v2252_v0  ;;  %v1311_v43 = vsel %vm1309_vm8, %v1306_v39, %v1308_v41 }
  0xa9   : > { %2071 = vmatprep.subr.msk.mxu0 %vm322_vm1, %v1142_v37  ;;  %v1477_v47 = vpop.permute.xlu1 %1476 }
  0xab   : > { %v1475_v45 = vpop.permute.xlu0 %1474 }
  0xac   : > { %v1480_v49 = vsel %vm1478_vm9, %v1475_v45, %v1477_v47 }
  0xad   : > { %2137 = vmatmul.mubr.msk.f32.vlgmr.msra.gmra.mrb[0].mxu1 %vm318_vm3, %v2064_v40  ;;  %v1644_v53 = vpop.permute.xlu1 %1643 }
  0xae   : > { %2140 = vmatpush3.msk.msra.mxu1 %vm322_vm1, %v1139_v35  ;;  %2141 = vmatprep.mubr.msk.f32.mxu1 %vm2253_vm0, %v2252_v0 }
  0xaf   : > { %2067 = vmatmul.mubr.msk.f32.vlgmr.msra.gmra.mrb[0].mxu0 %vm318_vm3, %v2064_v40  ;;  %2144 = vmatprep.subr.mxu1 %v2252_v0  ;;  %v1473_v50 = vpop.permute.xlu0 %1472 }
  0xb0   : > { %2072 = vmatpush1.msk.msra.mxu0 %vm322_vm1, %v1141_v42  ;;  %1216 = vmatprep.mubr.f32.mxu0 %v2252_v0  ;;  %v1479_v54 = vsel %vm1478_vm9, %v1473_v50, %v1475_v45 }
  0xb1   : > { %2077 = vmatprep.subr.msk.mxu0 %vm322_vm1, %v1311_v43  ;;  %v1642_v56 = vpop.permute.xlu1 %1641 }
  0xb2   : > { %v1648_v58 = vsel %vm1647_vm10, %v1642_v56, %v1644_v53 }
  0xb3   : > { %v1646_v52 = vpop.permute.xlu0 %1645 }
  0xb4   : > { %v1649_v55 = vsel %vm1647_vm10, %v1644_v53, %v1646_v52 }
  0xb5   : > { %2142 = vmatmul.mubr.msk.f32.vlgmr.msra.gmra.mrb[0].mxu1 %vm318_vm3, %v2070_v46 }
  0xb6   : > { %2145 = vmatpush3.msk.msra.mxu1 %vm322_vm1, %v1308_v41  ;;  %2146 = vmatprep.mubr.msk.f32.mxu1 %vm2253_vm0, %v2252_v0 }
  0xb7   : > { %2073 = vmatmul.mubr.msk.f32.vlgmr.msra.gmra.mrb[0].mxu0 %vm318_vm3, %v2070_v46  ;;  %2149 = vmatprep.subr.mxu1 %v2252_v0 }
  0xb8   : > { %2078 = vmatpush1.msk.msra.mxu0 %vm322_vm1, %v1310_v48  ;;  %1385 = vmatprep.mubr.f32.mxu0 %v2252_v0 }
  0xb9   : > { %2083 = vmatprep.subr.msk.mxu0 %vm322_vm1, %v1480_v49 }
  0xbd   : > { %2147 = vmatmul.mubr.msk.f32.vlgmr.msra.gmra.mrb[0].mxu1 %vm318_vm3, %v2076_v51 }
  0xbe   : > { %2150 = vmatpush3.msk.msra.mxu1 %vm322_vm1, %v1477_v47  ;;  %2151 = vmatprep.mubr.msk.f32.mxu1 %vm2253_vm0, %v2252_v0 }
  0xbf   : > { %2079 = vmatmul.mubr.msk.f32.vlgmr.msra.gmra.mrb[0].mxu0 %vm318_vm3, %v2076_v51  ;;  %2154 = vmatprep.subr.mxu1 %v2252_v0 }
  0xc0   : > { %2084 = vmatpush1.msk.msra.mxu0 %vm322_vm1, %v1479_v54  ;;  %1554 = vmatprep.mubr.f32.mxu0 %v2252_v0 }
  0xc1   : > { %2089 = vmatprep.subr.msk.mxu0 %vm322_vm1, %v1649_v55 }
  0xc5   : > { %2152 = vmatmul.mubr.msk.f32.vlgmr.msra.gmra.mrb[0].mxu1 %vm318_vm3, %v2082_v57 }
  0xc6   : > { %2155 = vmatpush3.msk.msra.mxu1 %vm322_vm1, %v1646_v52  ;;  %2156 = vmatprep.mubr.msk.f32.mxu1 %vm2253_vm0, %v2252_v0 }
  0xc7   : > { %2085 = vmatmul.mubr.msk.f32.vlgmr.msra.gmra.mrb[0].mxu0 %vm318_vm3, %v2082_v57 }
  0xc8   : > { %2090 = vmatpush1.msk.msra.mxu0 %vm322_vm1, %v1648_v58  ;;  %1723 = vmatprep.mubr.f32.mxu0 %v2252_v0  ;;  %v1820_v0 = vrot.slane %v1807_v1, %v1819_v62 }
  0xcd   : > { %2157 = vmatmul.mubr.msk.f32.vlgmr.msra.gmra.mrb[0].mxu1 %vm318_vm3, %v2088_v59 }
  0xcf   : > { %2091 = vmatmul.mubr.msk.f32.vlgmr.msra.gmra.mrb[0].mxu0 %vm318_vm3, %v2088_v59 }
 0x1a0   : > { %v1796_v4 = vpop.f32.mrb[0].mxu1 }
 0x1a1   : > { %1806 = vst.msk [vmem:[%s286_s11 + $0x10] sm:$0xff] %vm1805_vm11, %v1796_v4  ;;  %v2158_v6 = vpop.f32.mrb[1].mxu1  ;;  %v1826_v8 = vmul.f32 %v1820_v0, %v1796_v4 }
 0x1a2   : > { %v1725_v7 = vpop.f32.mrb[0].mxu0 }
 0x1a3   : > { %1803 = vst [vmem:[%s286_s11] sm:$0xff] %v1725_v7  ;;  %v1824_v9 = vmul.f32 %v1812_v3, %v1725_v7  ;;  %v1727_v10 = vpop.f32.mrb[1].mxu0  ;;  %v1828_v13 = vsel %vm1805_vm11, %v1826_v8, 0.0 }
 0x1a4   : > { %1804 = vst [vmem:[%s286_s11 + $0x8] sm:$0xff] %v1727_v10  ;;  %v1825_v11 = vmul.f32 %v1816_v5, %v1727_v10 }
 0x1a6   : > { %v1827_v12 = vadd.f32 %v1825_v11, %v1824_v9 }
 0x1a8   : > { %v1829_v14 = vadd.f32 %v1828_v13, %v1827_v12 }
 0x1aa   : > { %1830 = vadd.xlane.f32.xlu0 %v1829_v14 }
 0x237   : > { %v1831_v15 = vpop.xlane.xlu0 %1830 }
 0x238   : > { %v1832_v16 = vmul.f32 0.00390625, %v1831_v15  ;;  %1848 = vst.msk [vmem:[%s293_s15] sm:$0xff] %vm1847_vm12, %v1831_v15 }
 0x23a   : > { %v1833_v17 = vsub.f32 %v1725_v7, %v1832_v16  ;;  %v1834_v18 = vsub.f32 %v1727_v10, %v1832_v16  ;;  %v1835_v19 = vsub.f32 %v1796_v4, %v1832_v16 }
 0x23c   : > { %v1836_v20 = vmul.f32 %v1833_v17, %v1812_v3  ;;  %v1837_v21 = vmul.f32 %v1834_v18, %v1816_v5  ;;  %v1838_v22 = vmul.f32 %v1835_v19, %v1820_v0 }
 0x23e   : > { %v1839_v23 = vmul.f32 %v1836_v20, %v1836_v20  ;;  %v1840_v24 = vmul.f32 %v1837_v21, %v1837_v21  ;;  %v1841_v25 = vmul.f32 %v1838_v22, %v1838_v22 }
 0x240   : > { %v1842_v26 = vadd.f32 %v1840_v24, %v1839_v23  ;;  %v1843_v27 = vsel %vm1805_vm11, %v1841_v25, 0.0 }
 0x242   : > { %v1844_v28 = vadd.f32 %v1843_v27, %v1842_v26 }
 0x244   : > { %1845 = vadd.xlane.f32.xlu1 %v1844_v28 }
 0x2d1   : > { %v1846_v29 = vpop.xlane.xlu1 %1845 }
 0x2d2   : > { %1849 = vst.msk [vmem:[%s300_s17] sm:$0xff] %vm1847_vm12, %v1846_v29 }
 0x2d3 PF: > { %s16_s20 = sadd.s32 1, %s2250_s20   ;;  %s2481_s18 = smov %s2246_s19 }
 0x2d4   : > { %p13_p5 = scmp.ge.s32.totalorder %s16_s20, 4   ;;  %s2482_s19 = smov %s2484_s21 }
 0x2d6   :  { %15 = sbr.rel (!%p13_p5) target bundleno = 2 (0x2), region = 97 }

</bundles_post_ra>
